<compile_context>
chip_gen: v6e
topology: v6e:2x2x1
jax: 0.10.0
libtpu: 0.0.40
codegen_flags: <defaults>
</compile_context>

<pallas_src>
import functools

import jax
import jax.numpy as jnp
import numpy as np
from jax import lax
from jax.experimental import pallas as pl
from jax.experimental.pallas import tpu as pltpu


def _tap_table(K, p, h_left):
    """For each tap k: (parity, lane offset into the deinterleaved padded view)."""
    taps = []
    for k in range(K):
        d = k - p
        if d % 2 == 0:
            taps.append((0, d // 2 + h_left))
        else:
            taps.append((1, (d - 1) // 2 + h_left))
    return tuple(taps)


def down1d_kernel(x_ref, w_ref, b_ref, o_ref, slab_ref, *, taps, c_in, tl, multi_tile):
    """One grid step == one (batch, L_out-tile).

    x_ref:    (1, 2, C_in, L_half)  deinterleaved + zero-padded input (resident per batch)
    w_ref:    (C_out, K*C_in)       im2col weight matrix (resident, compute dtype)
    b_ref:    (C_out, 1)            bias (f32)
    o_ref:    (1, C_out, TL)        output tile (lane-dense)
    slab_ref: (K*C_in, TL)          transposed im2col staging scratch (compute dtype)
    """
    if multi_tile:
        base = pl.multiple_of(pl.program_id(1) * tl, tl)   # tl is a multiple of 128 here
    else:
        base = 0                                            # single tile: fully static slicing

    # Stage the transposed im2col slab: sublane block k holds conv tap k for every output
    # position of this tile; each tap is a contiguous (C_in, TL) lane slice and the store
    # covers all TL lanes (masked only on sublanes when C_in % 8 != 0).
    for k, (parity, off) in enumerate(taps):
        slab_ref[k * c_in:(k + 1) * c_in, :] = x_ref[0, parity, :, pl.ds(base + off, tl)]

    # Single canonical MXU matmul per tile: (C_out, K*C_in) . (K*C_in, TL) -> (C_out, TL),
    # in the input dtype (bf16 stays bf16) with f32 accumulation.  No RHS transpose, no
    # per-step weight re-cast.
    acc = lax.dot_general(
        w_ref[...], slab_ref[...],
        dimension_numbers=(((1,), (0,)), ((), ())),
        preferred_element_type=jnp.float32)
    acc = acc + b_ref[...]
    # leaky_relu, negative_slope=0.2  (one mul + one max)
    o_ref[0] = jnp.maximum(acc, 0.2 * acc).astype(o_ref.dtype)


def _pick_tile(l_out, c_out, target=1024):
    """Output-L tile: full length when short; else a fixed multiple of 128 (<= target),
    capped so the live f32 (C_out, TL) accumulator stays ~<= 1 MiB."""
    acc_cap = max(128, (((1 << 20) // (4 * c_out)) // 128) * 128)
    target = max(128, (min(target, acc_cap) // 128) * 128)
    if l_out <= 256:
        return l_out                       # single tile; block == full dim is legal
    return min(target, (l_out // 128) * 128)


def down1d_forward(x, w, b, *, l_tile_target=1024):
    """x: (N, C_in, L); w: (C_out, C_in, K); b: (C_out,).
    Matches Conv1d(stride=2, padding=K//2) + leaky_relu(0.2)."""
    N, C_in, L = x.shape
    C_out, _, K = w.shape
    stride = 2                          # module hardcodes stride=2
    p = K // 2                          # module hardcodes padding=int(kernel/2)
    L_out = (L + 2 * p - K) // stride + 1
    h_left = (p + 1) // 2               # ceil(p/2) left halo (deinterleaved coords)

    taps = _tap_table(K, p, h_left)
    max_off = max(off for _, off in taps)

    TL = _pick_tile(L_out, C_out, l_tile_target)
    n_tiles = (L_out + TL - 1) // TL
    # Padded deinterleaved length per parity: covers every in-kernel tap slice, including
    # the (output-masked) tail tile, so no OOB VMEM reads.
    L_half = n_tiles * TL + max_off

    # Single fused pad + deinterleave pass (keeps L on lanes):
    #   x_de[n, s, ci, m] = x[n, ci, 2*(m - h_left) + s],  zeros outside [0, L).
    pad_r = 2 * L_half - L - 2 * h_left
    x_p = jnp.pad(x, ((0, 0), (0, 0), (2 * h_left, pad_r)))
    x_de = jnp.transpose(x_p.reshape(N, C_in, L_half, 2), (0, 3, 1, 2))  # (N,2,C_in,L_half)

    # Weight/bias re-layout: im2col matrix in the compute dtype + f32 column bias.
    w_mat = jnp.transpose(w, (0, 2, 1)).reshape(C_out, K * C_in).astype(x.dtype)
    b_col = b.reshape(C_out, 1).astype(jnp.float32)

    kernel = functools.partial(down1d_kernel, taps=taps, c_in=C_in, tl=TL,
                               multi_tile=n_tiles > 1)

    # VMEM budget: single-buffered resident input block, double-buffered output tile,
    # resident weights/bias, im2col scratch.  Clamp to the real chip capacity
    # (v7x has 64 MiB per TensorCore, not 128).
    isz = x.dtype.itemsize
    vmem_need = (2 * C_in * L_half * isz            # x_de block (1 buffer)
                 + 2 * C_out * TL * isz             # output tile x2 buffers
                 + C_out * K * C_in * isz           # weights
                 + C_out * 512                      # bias (lane-padded)
                 + K * C_in * TL * isz)             # im2col scratch
    try:
        vmem_cap = int(pltpu.get_tpu_info().vmem_capacity_bytes)
    except Exception:
        vmem_cap = 64 * 2 ** 20                     # conservative fallback (v7x size)
    vmem_limit = int(min(int(0.9 * vmem_cap), max(32 * 2 ** 20, 2 * vmem_need)))

    # Megacore: split batches across cores when there are several (so two cores don't
    # re-DMA the same per-batch input block); otherwise split the L tiles.
    dim_sem = ("parallel", "arbitrary") if N > 1 else ("arbitrary", "parallel")

    return pl.pallas_call(
        kernel,
        out_shape=jax.ShapeDtypeStruct((N, C_out, L_out), x.dtype),
        grid_spec=pltpu.PrefetchScalarGridSpec(
            num_scalar_prefetch=0,
            grid=(N, n_tiles),
            in_specs=[
                # Deinterleaved input: constant across the L-tile axis -> DMA'd once per
                # batch; single-buffered since it only changes at batch boundaries.
                pl.BlockSpec((1, 2, C_in, L_half), lambda n, t: (n, 0, 0, 0),
                             pipeline_mode=pl.Buffered(1)),
                # Weights / bias: constant index map -> fetched once, stay VMEM-resident.
                pl.BlockSpec((C_out, K * C_in), lambda n, t: (0, 0)),
                pl.BlockSpec((C_out, 1), lambda n, t: (0, 0)),
            ],
            out_specs=pl.BlockSpec((1, C_out, TL), lambda n, t: (n, 0, t)),
            scratch_shapes=[pltpu.VMEM((K * C_in, TL), x.dtype)],
        ),
        compiler_params=pltpu.CompilerParams(
            dimension_semantics=dim_sem,
            vmem_limit_bytes=vmem_limit),
    )(x_de, w_mat, b_col)


def make_params(key, in_channel, out_channel, kernel):
    """Deterministic params. Weight ~ orthogonal_ (rows orthonormal when possible)."""
    kw, kb = jax.random.split(key)
    flat = jax.random.normal(kw, (out_channel, in_channel * kernel), jnp.float32)
    q, r = jnp.linalg.qr(flat.T)                 # q: (in*k, out)
    d = jnp.sign(jnp.diag(r))
    w = (q * d[None, :]).T.reshape(out_channel, in_channel, kernel)
    bound = 1.0 / np.sqrt(in_channel * kernel)
    b = jax.random.uniform(kb, (out_channel,), jnp.float32, -bound, bound)
    return w.astype(jnp.float32), b


def reference_forward(x, w, b):
    """Pure-JAX reference (lax conv, full-precision) for correctness check."""
    K = w.shape[-1]
    y = jax.lax.conv_general_dilated(
        x, w, window_strides=(2,), padding=[(K // 2, K // 2)],
        dimension_numbers=("NCH", "OIH", "NCH"),
        precision=jax.lax.Precision.HIGHEST)
    y = y + b[None, :, None]
    return jnp.where(y >= 0, y, 0.2 * y)


if __name__ == "__main__":
    key = jax.random.PRNGKey(0)

    # (N, C_in, L, C_out, K, dtype, tol):
    #   1) baseline small case (single tile, fully static slicing)
    #   2) even kernel size
    #   3) multi-tile output with masked tail (L_out=300 -> TL=256, 2 tiles)
    #   4) bf16 inputs (bf16 slab + bf16 MXU path)
    cases = [
        (2, 4, 16, 8, 5, jnp.float32, 1e-4),
        (2, 4, 16, 8, 4, jnp.float32, 1e-4),
        (1, 4, 600, 8, 5, jnp.float32, 1e-4),
        (2, 4, 16, 8, 5, jnp.bfloat16, 5e-2),
    ]
    for i, (N, C_in, L, C_out, K, dt, tol) in enumerate(cases):
        k_x, k_p = jax.random.split(jax.random.fold_in(key, i))
        x = jax.random.normal(k_x, (N, C_in, L), jnp.float32)
        w, b = make_params(k_p, C_in, C_out, K)
        out = jax.block_until_ready(down1d_forward(x.astype(dt), w.astype(dt), b))
        ref = reference_forward(x, w, b)
        assert out.shape == ref.shape, (out.shape, ref.shape)
        np.testing.assert_allclose(np.asarray(out, dtype=np.float32), np.asarray(ref),
                                   atol=tol, rtol=tol)

    print("KERNEL_OK")
</pallas_src>

<mosaic_0001>
module attributes {stable_mosaic.version = 11 : i64} {
  func.func @down1d_kernel(%arg0: i32, %arg1: i32, %arg2: memref<1x2x4x10xf32, #tpu.memory_space<vmem>>, %arg3: memref<8x20xf32, #tpu.memory_space<vmem>>, %arg4: memref<8x1xf32, #tpu.memory_space<vmem>>, %arg5: memref<1x8x8xf32, #tpu.memory_space<vmem>>, %arg6: memref<20x8xf32, #tpu.memory_space<vmem>>) attributes {dimension_semantics = [#tpu.dimension_semantics<parallel>, #tpu.dimension_semantics<arbitrary>], iteration_bounds = array<i64: 2, 1>, scalar_prefetch = 0 : i64, scratch_operands = 1 : i64, tpu.core_type = #tpu.core_type<tc>, window_params = [{pipeline_mode = #tpu.pipeline_mode<synchronous>, transform_indices = @transform_0, window_bounds = array<i64: 1, 2, 4, 10>}, {pipeline_mode = #tpu.pipeline_mode<synchronous>, transform_indices = @transform_1, window_bounds = array<i64: 8, 20>}, {pipeline_mode = #tpu.pipeline_mode<synchronous>, transform_indices = @transform_2, window_bounds = array<i64: 8, 1>}, {transform_indices = @transform_3, window_bounds = array<i64: 1, 8, 8>}]} {
    %c0 = arith.constant 0 : index
    %c0_0 = arith.constant 0 : index
    %c0_1 = arith.constant 0 : index
    %c0_2 = arith.constant 0 : index
    %0 = vector.load %arg2[%c0, %c0_0, %c0_1, %c0_2] : memref<1x2x4x10xf32, #tpu.memory_space<vmem>>, vector<1x1x4x8xf32>
    %1 = vector.shape_cast %0 : vector<1x1x4x8xf32> to vector<4x8xf32>
    %c0_3 = arith.constant 0 : index
    %c0_4 = arith.constant 0 : index
    %2 = vector.load %arg6[%c0_3, %c0_4] : memref<20x8xf32, #tpu.memory_space<vmem>>, vector<4x8xf32>
    tpu.vector_store %arg6[%c0_3, %c0_4], %1 {strides = array<i32>} : memref<20x8xf32, #tpu.memory_space<vmem>>, vector<4x8xf32>,
    %c0_5 = arith.constant 0 : index
    %c1 = arith.constant 1 : index
    %c0_6 = arith.constant 0 : index
    %c0_7 = arith.constant 0 : index
    %3 = vector.load %arg2[%c0_5, %c1, %c0_6, %c0_7] : memref<1x2x4x10xf32, #tpu.memory_space<vmem>>, vector<1x1x4x8xf32>
    %4 = vector.shape_cast %3 : vector<1x1x4x8xf32> to vector<4x8xf32>
    %c4 = arith.constant 4 : index
    %c0_8 = arith.constant 0 : index
    %5 = vector.load %arg6[%c4, %c0_8] : memref<20x8xf32, #tpu.memory_space<vmem>>, vector<4x8xf32>
    tpu.vector_store %arg6[%c4, %c0_8], %4 {strides = array<i32>} : memref<20x8xf32, #tpu.memory_space<vmem>>, vector<4x8xf32>,
    %c0_9 = arith.constant 0 : index
    %c0_10 = arith.constant 0 : index
    %c0_11 = arith.constant 0 : index
    %c1_12 = arith.constant 1 : index
    %6 = vector.load %arg2[%c0_9, %c0_10, %c0_11, %c1_12] : memref<1x2x4x10xf32, #tpu.memory_space<vmem>>, vector<1x1x4x8xf32>
    %7 = vector.shape_cast %6 : vector<1x1x4x8xf32> to vector<4x8xf32>
    %c8 = arith.constant 8 : index
    %c0_13 = arith.constant 0 : index
    %8 = vector.load %arg6[%c8, %c0_13] : memref<20x8xf32, #tpu.memory_space<vmem>>, vector<4x8xf32>
    tpu.vector_store %arg6[%c8, %c0_13], %7 {strides = array<i32>} : memref<20x8xf32, #tpu.memory_space<vmem>>, vector<4x8xf32>,
    %c0_14 = arith.constant 0 : index
    %c1_15 = arith.constant 1 : index
    %c0_16 = arith.constant 0 : index
    %c1_17 = arith.constant 1 : index
    %9 = vector.load %arg2[%c0_14, %c1_15, %c0_16, %c1_17] : memref<1x2x4x10xf32, #tpu.memory_space<vmem>>, vector<1x1x4x8xf32>
    %10 = vector.shape_cast %9 : vector<1x1x4x8xf32> to vector<4x8xf32>
    %c12 = arith.constant 12 : index
    %c0_18 = arith.constant 0 : index
    %11 = vector.load %arg6[%c12, %c0_18] : memref<20x8xf32, #tpu.memory_space<vmem>>, vector<4x8xf32>
    tpu.vector_store %arg6[%c12, %c0_18], %10 {strides = array<i32>} : memref<20x8xf32, #tpu.memory_space<vmem>>, vector<4x8xf32>,
    %c0_19 = arith.constant 0 : index
    %c0_20 = arith.constant 0 : index
    %c0_21 = arith.constant 0 : index
    %c2 = arith.constant 2 : index
    %12 = vector.load %arg2[%c0_19, %c0_20, %c0_21, %c2] : memref<1x2x4x10xf32, #tpu.memory_space<vmem>>, vector<1x1x4x8xf32>
    %13 = vector.shape_cast %12 : vector<1x1x4x8xf32> to vector<4x8xf32>
    %c16 = arith.constant 16 : index
    %c0_22 = arith.constant 0 : index
    %14 = vector.load %arg6[%c16, %c0_22] : memref<20x8xf32, #tpu.memory_space<vmem>>, vector<4x8xf32>
    tpu.vector_store %arg6[%c16, %c0_22], %13 {strides = array<i32>} : memref<20x8xf32, #tpu.memory_space<vmem>>, vector<4x8xf32>,
    %c0_23 = arith.constant 0 : index
    %c0_24 = arith.constant 0 : index
    %15 = vector.load %arg3[%c0_23, %c0_24] : memref<8x20xf32, #tpu.memory_space<vmem>>, vector<8x20xf32>
    %c0_25 = arith.constant 0 : index
    %c0_26 = arith.constant 0 : index
    %16 = vector.load %arg6[%c0_25, %c0_26] : memref<20x8xf32, #tpu.memory_space<vmem>>, vector<20x8xf32>
    %cst = arith.constant dense<0.000000e+00> : vector<8x8xf32>
    %17 = tpu.matmul %15, %16, %cst {dimension_numbers = #tpu.dot_dimension_numbers<[1], [0], [0], [1], [0, 0, 1, 1], [], []>} : vector<8x20xf32>, vector<20x8xf32>, vector<8x8xf32> -> vector<8x8xf32>
    %c0_27 = arith.constant 0 : index
    %c0_28 = arith.constant 0 : index
    %18 = vector.load %arg4[%c0_27, %c0_28] : memref<8x1xf32, #tpu.memory_space<vmem>>, vector<8x1xf32>
    %19 = vector.broadcast %18 : vector<8x1xf32> to vector<8x8xf32>
    %20 = arith.addf %17, %19 : vector<8x8xf32>
    %cst_29 = arith.constant 2.000000e-01 : f32
    %21 = vector.broadcast %cst_29 : f32 to vector<8x8xf32>
    %22 = arith.mulf %21, %20 : vector<8x8xf32>
    %23 = arith.maximumf %20, %22 : vector<8x8xf32>
    %c0_30 = arith.constant 0 : index
    %c0_31 = arith.constant 0 : index
    %c0_32 = arith.constant 0 : index
    %24 = vector.load %arg5[%c0_30, %c0_31, %c0_32] : memref<1x8x8xf32, #tpu.memory_space<vmem>>, vector<1x8x8xf32>
    %25 = vector.shape_cast %24 : vector<1x8x8xf32> to vector<8x8xf32>
    %26 = vector.shape_cast %23 : vector<8x8xf32> to vector<1x8x8xf32>
    tpu.vector_store %arg5[%c0_30, %c0_31, %c0_32], %26 {strides = array<i32>} : memref<1x8x8xf32, #tpu.memory_space<vmem>>, vector<1x8x8xf32>,
    return
  }
  func.func @transform_0(%arg0: i32, %arg1: i32) -> (i32, i32, i32, i32) {
    %c0_i32 = arith.constant 0 : i32
    %c0_i32_0 = arith.constant 0 : i32
    %c0_i32_1 = arith.constant 0 : i32
    %c0_i32_2 = arith.constant 0 : i32
    return %arg0, %c0_i32, %c0_i32_0, %c0_i32_1 : i32, i32, i32, i32
  }
  func.func @transform_1(%arg0: i32, %arg1: i32) -> (i32, i32) {
    %c0_i32 = arith.constant 0 : i32
    %c0_i32_0 = arith.constant 0 : i32
    %c0_i32_1 = arith.constant 0 : i32
    return %c0_i32, %c0_i32_0 : i32, i32
  }
  func.func @transform_2(%arg0: i32, %arg1: i32) -> (i32, i32) {
    %c0_i32 = arith.constant 0 : i32
    %c0_i32_0 = arith.constant 0 : i32
    %c0_i32_1 = arith.constant 0 : i32
    return %c0_i32, %c0_i32_0 : i32, i32
  }
  func.func @transform_3(%arg0: i32, %arg1: i32) -> (i32, i32, i32) {
    %c0_i32 = arith.constant 0 : i32
    %c0_i32_0 = arith.constant 0 : i32
    return %arg0, %c0_i32, %arg1 : i32, i32, i32
  }
}

</mosaic_0001>

<bundles_post_ra>
// kernel: tpu_custom_call.1
= control target key start
LH: loop header
LB: loop body
LE: loop exit
PB: predicated region body
PF: predicated region fallthrough
CT: control target
= control target key end

     0   :  { %8 = vsyncpa [#allocation4], 0  ;;  %s768_s0 = inlined_call_operand.hbm [shape: f32[2,2,4,10], index: 0, kind: input, shape index: {}]   ;;  %s769_s1 = inlined_call_operand.vmem [shape: f32[8,20], index: 1, kind: input, shape index: {}]   ;;  %s770_s2 = inlined_call_operand.vmem [shape: f32[8,1], index: 2, kind: input, shape index: {}]   ;;  %s771_s3 = inlined_call_operand.hbm [shape: f32[2,8,8], index: 3, kind: output, shape index: {}]  }
   0x1   :  { %9 = vsyncpa [#allocation5], 0 }
   0x2   :  { %11 = vsyncpa [#allocation5 + $0x1], 0  ;;  %s624_s12 = smov 0   ;;  %s626_s13 = smov 0  }
   0x3   :  { %s628_s14 = smov 0   ;;  %s630_s15 = smov 0  }
   0x4   :  { %s632_s16 = smov 0   ;;  %s634_s17 = smov 0  }
   0x5 LB: > { %s387_s18 = sadd.s32 4294967295, %s593_s17   ;;  %s388_s19 = sadd.s32 4294967294, %s593_s17   ;;  %s593_s17 = sphi %s634_s17, %s17_s17   ;;  %s589_s16 = sphi %s632_s16, %s789_s16   ;;  %s585_s15 = sphi %s630_s15, %s788_s15   ;;  %s581_s14 = sphi %s628_s14, %s787_s14   ;;  %s577_s13 = sphi %s626_s13, %s786_s13   ;;  %s573_s12 = sphi %s624_s12, %s785_s12  }
   0x6   : > { %s29_s20 = sadd.s32 1, %s589_s16  ;;  %s36_s21 = sadd.s32 1, %s581_s14 }
   0x7   : > { %p31_p0 = scmp.ge.s32.totalorder %s29_s20, 2  ;;  %p49_p1 = scmp.ne.s32.totalorder %s577_s13, %s573_s12 }
   0x8   : > { %p116_p2 = scmp.ne.s32.totalorder %s581_s14, %s577_s13  ;;  %p50_p3 = scmp.eq.s32.totalorder %s387_s18, 0 }
   0x9   : > { %s791_s20 = smov (%p31_p0, %s29_s20), 0  ;;  %p117_p4 = scmp.eq.s32.totalorder %s387_s18, 1 }
   0xa   : > { %s33_s22 = ssub.s32 %s589_s16, %s791_s20  ;;  %p123_p5 = scmp.eq.s32.totalorder %s388_s19, 1 }
   0xb   : > { %p34_p6 = scmp.eq.s32.totalorder %s33_s22, 0  ;;  %p666_p7 = por %p117_p4, %p116_p2 }
   0xc   : > { %p670_p8 = por %p123_p5, %p49_p1  ;;  %p389_p9 = scmp.ge.s32.totalorder %s593_s17, 1 }
   0xd   : > { %s776_s23 = scalar_select %p666_p7, 1, 0 }
   0xe   : > { %s777_s24 = scalar_select %p670_p8, 1, 0 }
   0xf   : > { %s676_s25 = scalar_select %p34_p6, %s581_s14, %s36_s21  }
  0x10   : > { %p678_p10 = por %p50_p3, %p49_p1  ;;  %p130_p11 = scmp.lt.s32.totalorder %s593_s17, 3 }
  0x11   : > { %s400_s27 = sshll.u32 %s585_s15, 7  ;;  %s595_s29 = smov [#allocation3]  }
  0x12   : > { %s778_s26 = scalar_select %p678_p10, 1, 0 }
  0x13   : > { %p684_p12 = pnand %p389_p9, %p130_p11  ;;  %s145_s30 = sshll.u32 %s595_s29, 4  ;;  %s146_s30 = int_to_ptr.vmem [resolvable:$true] %s145_s30 }
  0x14   : > { %s144_s6 = scalar_lea.hbm %s768_s0, %s400_s27  ;;  %s490_s11 = scalar_lea.hbm %s768_s0, 256 }
  0x15   : > { %s779_s28 = scalar_select %p684_p12, 1, 0 }
  0x16   : > { %p418_p13 = pneg %p684_p12  ;;  %s485_s8 = scalar_lea.hbm %s144_s6, 128 }
  0x17   : > { %p486_p1 = scmp.ne.s32.totalorder %s144_s6, %s485_s8  ;;  %p491_p5 = scmp.lt.s32.totalorder %s144_s6, %s768_s0 }
  0x18   : > { %p697_p0 = pnand %p418_p13, %p678_p10  ;;  %p492_p6 = scmp.lt.s32.totalorder %s490_s11, %s485_s8 }
  0x1a   : > { %p487_p2 = pneg %p697_p0  ;;  %p493_p9 = por %p492_p6, %p491_p5 }
  0x1c   : > { %p488_p3 = pnand %p487_p2, %p486_p1 }
  0x1e   : > { %p489_p4 = pneg %p488_p3 }
  0x20   : > { %p494_p11 = pnand %p493_p9, %p489_p4 }
  0x22   : > { %497 = shalt.err (!%p494_p11)
}
  0x23   : > { %s498_s21 = scalar_lea.vmem %s146_s30, 128  ;;  %p506_p10 = scmp.lt.s32.totalorder %s146_s30, %s146_s30 }
  0x24   : > { %p499_p13 = scmp.ne.s32.totalorder %s146_s30, %s498_s21  ;;  %p507_p12 = scmp.lt.s32.totalorder %s498_s21, %s498_s21 }
  0x26   : > { %p501_p8 = pnand %p499_p13, %p487_p2  ;;  %p508_p1 = por %p507_p12, %p506_p10 }
  0x28   : > { %p502_p7 = pneg %p501_p8 }
  0x2a   : > { %p509_p3 = pnand %p508_p1, %p502_p7 }
  0x2c   : > { %512 = shalt.err (!%p509_p3)
}
  0x2d   : > { %s596_s22 = smov 64   ;;  %s597_s29 = smov 4  }
  0x2e   : > { %421 = dma.hbm_to_vmem [thread:$0]  (!%p697_p0), %s144_s6, 128, %s146_s30, [#allocation4], %s596_s22, %s596_s22, %s597_s29  }
  0x2f   : > { %p781_p5 = scmp.ne.s32.totalorder %s779_s28, 0 }
  0x30   : > { %p782_p4 = scmp.ne.s32.totalorder (!%p781_p5), %s778_s26, 0 }
  0x31   : > { %167 = sbr.rel (%p781_p5) target bundleno = 399 (0x18f), region = 32 }
  0x36   : > { %564 = dma.done.wait (%p782_p4), [#allocation4], 128  }
  0x37   : > { %566 = vsyncadd (%p782_p4), [#allocation4], 4294967168  ;;  %v598_v0 = vmov 0.0   ;;  %v204_v1 = vld [vmem:[#allocation3] sm:$0xf]  ;;  %s599_s4 = smov 126   ;;  %s315_s19 = scalar_lea.hbm %s771_s3, %s400_s27 }
  0x38   : > { %405 = vmatprep.subr.mxu0 %v598_v0  ;;  %v198_v2 = vld [vmem:[#allocation3 + $0x4] sm:$0xf]  ;;  %206 = vrot.lane.b32.xlu0 %v204_v1, %s599_s4  ;;  %s600_s5 = smov 127   ;;  %vm187_vm0 = vcmask 60416   ;;  %v186_v3 = vld [vmem:[#allocation3] sm:$0xf] }
  0x39   : > { %200 = vrot.lane.b32.xlu1 %v198_v2, %s600_s5  ;;  %v190_v4 = vld [vmem:[#allocation3 + $0x4] sm:$0xf]  ;;  %v192_v5 = vld [vmem:[#allocation3] sm:$0xf]  ;;  %188 = vst.msk [vmem:[#allocation2] sm:$0xf] %vm187_vm0, %v186_v3 }
  0x3a   : > { %191 = vst.msk [vmem:[#allocation2 + $0x4] sm:$0xf] %vm187_vm0, %v190_v4  ;;  %vm601_vm1 = vmmov 0   ;;  %v214_v6 = vld [vmem:[%s770_s2] sm:$0xff]  ;;  %v602_v7 = vmov 0   ;;  %vm224_vm2 = vcmask 1043456  }
  0x3b   : > { %411 = vmatprep.mubr.msk.f32.mxu0 %vm601_vm1, %v598_v0  ;;  %483 = vset.pattern.permute.xlu1 %v602_v7  ;;  %v210_v14 = vld [vmem:[%s769_s1] sm:$0xff]  ;;  %vm220_vm3 = vcmask 162816   ;;  %s183_s7 = sand.u32 1, %s577_s13   ;;  %vm300_vm4 = vcmask 64512   ;;  %p783_p8 = scmp.ne.s32.totalorder %s776_s23, 0 }
  0x3c   : > { %484 = vset.pattern.permute.xlu0 %v602_v7  ;;  %s393_s8 = sshll.u32 %s183_s7, 3  ;;  %s303_s21 = scalar_lea.sflag [#allocation5], %s183_s7 }
  0x3d   : > { %194 = vrot.lane.b32.xlu0 %v192_v5, %s600_s5  ;;  %217 = vperm.xlu1 %483, %v214_v6   ;;  %s185_s9 = scalar_lea.vmem [#allocation6], %s393_s8  ;;  %s603_s29 = smov [#allocation6]  }
  0x3e   : > { %s317_s10 = sshll.u32 %s185_s9, 4  ;;  %s517_s4 = sshll.u32 %s603_s29, 4  ;;  %s318_s10 = int_to_ptr.vmem [resolvable:$true] %s317_s10  ;;  %s518_s4 = int_to_ptr.vmem [resolvable:$false] %s517_s4 }
  0x3f   : > { %s513_s22 = scalar_lea.vmem %s318_s10, 128  ;;  %s519_s5 = scalar_lea.vmem %s518_s4, 256 }
  0x40   : > { %p514_p7 = scmp.ne.s32.totalorder %s318_s10, %s513_s22  ;;  %p520_p0 = scmp.lt.s32.totalorder %s318_s10, %s518_s4 }
  0x41   : > { %v211_v13 = vld [vmem:[#allocation2] sm:$0xff]  ;;  %p521_p2 = scmp.lt.s32.totalorder %s519_s5, %s513_s22 }
  0x42   : > { %p515_p10 = pnand %p514_p7, %p783_p8 }
  0x43   : > { %p522_p6 = por %p521_p2, %p520_p0 }
  0x44   : > { %p516_p12 = pneg %p515_p10 }
  0x46   : > { %p523_p9 = pnand %p522_p6, %p516_p12 }
  0xaa   : > { %v207_v8 = vpop.permute.xlu0 %206 }
  0xab   : > { %v201_v9 = vpop.permute.xlu1 %200  ;;  %209 = vst.msk [vmem:[#allocation2 + $0x10] sm:$0xf] %vm187_vm0, %v207_v8 }
  0xac   : > { %203 = vst.msk [vmem:[#allocation2 + $0xc] sm:$0xf] %vm187_vm0, %v201_v9 }
  0xaf   : > { %v195_v10 = vpop.permute.xlu0 %194 }
  0xb0   : > { %197 = vst.msk [vmem:[#allocation2 + $0x8] sm:$0xf] %vm187_vm0, %v195_v10 }
  0xb2   : > { %v213_v11 = vld [vmem:[#allocation2 + $0x10] sm:$0xf] }
  0xb3   : > { %406 = vmatpush3.msk.msra.mxu0 %vm224_vm2, %v213_v11 }
  0xb4   : > { %407 = vmatprep.subr.mxu0 %v598_v0 }
  0xb7   : > { %v212_v12 = vld [vmem:[#allocation2 + $0x8] sm:$0xff] }
  0xb8   : > { %408 = vmatpush3.msra.mxu0 %v212_v12  ;;  %v218_v15 = vpop.permute.xlu1 %217 }
  0xb9   : > { %409 = vmatprep.subr.mxu0 %v598_v0 }
  0xba   : > { %410 = vmatpush3.msra.mxu0 %v211_v13 }
  0xbb   : > { %412 = vmatmul.mubr.msk.f32.vlgmr.msra.gmra.mxu0 %vm220_vm3, %v210_v14 }
 0x17b   : > { %v294_v16 = vpop.f32.mrf.mxu0 }
 0x17c   : > { %v295_v17 = vadd.f32 %v294_v16, %v218_v15 }
 0x17d   : > { %v413_v18 = vpop.f32.mrf.mxu0 }
 0x17e   : > { %v298_v19 = vmul.f32 0.2, %v295_v17 }
 0x180   : > { %v299_v20 = vmax.f32 %v295_v17, %v298_v19 }
 0x182   : > { %301 = vst.msk [vmem:[%s185_s9] sm:$0xff] %vm300_vm4, %v299_v20 }
 0x183   : > { %526 = shalt.err (!%p523_p9)
}
 0x184   : > { %s527_s15 = scalar_lea.hbm %s315_s19, 128  ;;  %s531_s28 = scalar_lea.hbm %s771_s3, 256 }
 0x185   : > { %p528_p11 = scmp.ne.s32.totalorder %s315_s19, %s527_s15  ;;  %p532_p3 = scmp.lt.s32.totalorder %s315_s19, %s771_s3 }
 0x186   : > { %p533_p5 = scmp.lt.s32.totalorder %s531_s28, %s527_s15 }
 0x187   : > { %p529_p13 = pnand %p528_p11, %p783_p8 }
 0x188   : > { %p534_p4 = por %p533_p5, %p532_p3 }
 0x189   : > { %p530_p1 = pneg %p529_p13 }
 0x18b   : > { %p535_p7 = pnand %p534_p4, %p530_p1 }
 0x18d   : > { %538 = shalt.err (!%p535_p7)
}
 0x18e   : > { %416 = dma.vmem_to_hbm [thread:$0]  (%p783_p8), %s318_s10, 128, %s315_s19, %s303_s21  }
 0x18f PF: > { %p426_p10 = scmp.ge.s32.totalorder %s593_s17, 2  ;;  %s329_s7 = sand.u32 1, %s573_s12  }
 0x190   : > { %p784_p12 = scmp.ne.s32.totalorder %s777_s24, 0  ;;  %s330_s8 = scalar_lea.sflag [#allocation5], %s329_s7 }
 0x192   : > { %p423_p0 = pnand %p426_p10, %p784_p12 }
 0x194   : > { %p424_p2 = pneg %p423_p0 }
 0x196   : > { %568 = dma.done.wait (%p424_p2), %s330_s8, 128  }
 0x197   : > { %570 = vsyncadd (%p424_p2), %s330_s8, 4294967168  ;;  %s17_s17 = sadd.s32 1, %s593_s17   ;;  %s785_s12 = smov %s577_s13 }
 0x198   : > { %p14_p6 = scmp.ge.s32.totalorder %s17_s17, 4   ;;  %s786_s13 = smov %s581_s14 }
 0x199   : > { %s787_s14 = smov %s676_s25  ;;  %s788_s15 = smov %s589_s16 }
 0x19a   : > { %s789_s16 = smov %s791_s20  ;;  %16 = sbr.rel (!%p14_p6) target bundleno = 5 (0x5), region = 71 }
 0x19f   :  { %335 = vsyncpa [#allocation4], 1 }
 0x1a0   :  { %337 = vsyncpa [#allocation4 + $0x1], 1 }
 0x1a1   :  { %338 = vsyncpa [#allocation5], 1 }
 0x1a2   :  { %340 = vsyncpa [#allocation5 + $0x1], 1 }

</bundles_post_ra>
